<compile_context>
chip_gen: v6e
topology: v6e:2x2x1
jax: 0.10.0
libtpu: 0.0.40
codegen_flags: <defaults>
</compile_context>

<pallas_src>
import jax
import jax.numpy as jnp
from jax import lax
from jax.experimental import pallas as pl
from jax.experimental.pallas import tpu as pltpu

# ----------------------------- problem sizes --------------------------------
S_LEN = 8       # src sent len
T_LEN = 8       # trg sent len
BATCH = 4       # batch size
EMB = 32        # embedding dim
HID = 32        # hidden dim
SRC_VOCAB = 20
TRG_VOCAB = 16
PAD_IDX = 1
UNK_IDX = 0


def _full_spec(shape):
    """BlockSpec covering the whole array (grid=(1,))."""
    return pl.BlockSpec(shape, lambda i, n=len(shape): (0,) * n)


# ----------------------------- Pallas kernels -------------------------------
def _rnn_kernel(h0_ref, x_ref, wih_ref, whh_ref, b_ref, out_ref):
    """tanh-RNN over a full sequence in one invocation.

    x_ref   : (T*B, E)  time-major rows (row = t*B + b)
    h0_ref  : (B, H)
    out_ref : (T*B, H)  hidden state for every step, time-major rows
    """
    TB = x_ref.shape[0]
    B = h0_ref.shape[0]
    T = TB // B

    # Hoisted input projection: one (T*B, E) @ (E, H) matmul + bias.
    xp = (jnp.dot(x_ref[...], wih_ref[...], preferred_element_type=jnp.float32)
          + b_ref[...])                                     # (T*B, H)

    whh = whh_ref[...]                                      # (H, H)
    h = h0_ref[...]                                         # (B, H)

    # Fully unrolled recurrence (T is a static Python int): only the small
    # (B,H)@(H,H) matmul + tanh are serialized.
    for t in range(T):
        h = jnp.tanh(xp[t * B:(t + 1) * B, :]
                     + jnp.dot(h, whh, preferred_element_type=jnp.float32))
        out_ref[t * B:(t + 1) * B, :] = h


def rnn_forward(h0, x_flat, w_ih, w_hh, b):
    """x_flat: (T*B, E) time-major.  Returns (T*B, H) time-major hiddens."""
    TB, E = x_flat.shape
    B, H = h0.shape
    return pl.pallas_call(
        _rnn_kernel,
        out_shape=jax.ShapeDtypeStruct((TB, H), jnp.float32),
        grid=(1,),
        in_specs=[
            _full_spec((B, H)),
            _full_spec((TB, E)),
            _full_spec((E, H)),
            _full_spec((H, H)),
            _full_spec((1, H)),
        ],
        out_specs=_full_spec((TB, H)),
        compiler_params=pltpu.CompilerParams(
            dimension_semantics=("arbitrary",)),
    )(h0, x_flat, w_ih, w_hh, b)


def _attn_out_kernel(dec_ref, enc_ref, mask_ref, wh_ref, wc_ref, b_ref,
                     probs_ref, attn_ref, pgen_ref):
    """Fused Luong attention + output projection + pointer gate, all T steps.

    dec_ref  : (B, T, H)   decoder hiddens, batch-major
    enc_ref  : (B, S, H)   encoder outputs, batch-major
    mask_ref : (B, S)      1.0 = valid source position
    wh_ref   : (H, V+1)    [output proj | p_gen] weights applied to hidden
    wc_ref   : (H, V+1)    [output proj | p_gen] weights applied to context
    b_ref    : (1, V+1)    fused bias
    probs_ref: (B, T, V+S) extended distribution (gen vocab + copy positions)
    attn_ref : (B, T, S)
    pgen_ref : (B, T, 1)
    """
    B = dec_ref.shape[0]
    V = wh_ref.shape[1] - 1

    wh = wh_ref[...]
    wc = wc_ref[...]
    bias = b_ref[...]                                        # (1, V+1)
    mall = mask_ref[...]                                     # (B, S)

    for b in range(B):                                       # static, B=4
        dh = dec_ref[b]                                      # (T, H)
        eb = enc_ref[b]                                      # (S, H)
        msk = mall[b:b + 1, :]                               # (1, S)

        # attention scores (T,H)@(H,S) and masked softmax
        sc = lax.dot_general(dh, eb, (((1,), (1,)), ((), ())),
                             preferred_element_type=jnp.float32)   # (T, S)
        sc = jnp.where(msk > 0.5, sc, -1e30)
        m = jnp.max(sc, axis=-1, keepdims=True)
        e = jnp.exp(sc - m)
        att = e * pl.reciprocal(jnp.sum(e, axis=-1, keepdims=True),
                                approx=True)                 # (T, S)

        # context vector (T,S)@(S,H)
        ctx = jnp.dot(att, eb, preferred_element_type=jnp.float32)  # (T, H)

        # fused [output logits | p_gen] projection: (T,H)@(H,V+1)
        zlog = (jnp.dot(dh, wh, preferred_element_type=jnp.float32)
                + jnp.dot(ctx, wc, preferred_element_type=jnp.float32)
                + bias)                                      # (T, V+1)
        logits = zlog[:, :V]                                 # (T, V)
        zg = zlog[:, V:V + 1]                                # (T, 1)

        lm = jnp.max(logits, axis=-1, keepdims=True)
        le = jnp.exp(logits - lm)
        gen = le * pl.reciprocal(jnp.sum(le, axis=-1, keepdims=True),
                                 approx=True)                # (T, V)
        pg = pl.reciprocal(1.0 + jnp.exp(-zg), approx=True)  # (T, 1)

        # single-write extended distribution row [p_gen*gen | (1-p_gen)*att]
        probs_ref[b] = jnp.concatenate([pg * gen, (1.0 - pg) * att], axis=-1)
        attn_ref[b] = att
        pgen_ref[b] = pg


def attend_project(dec_bth, enc_bsh, mask, w_h_ext, w_c_ext, b_ext):
    B, T, H = dec_bth.shape
    S = enc_bsh.shape[1]
    Vp1 = w_h_ext.shape[1]
    V = Vp1 - 1
    out_shapes = (
        jax.ShapeDtypeStruct((B, T, V + S), jnp.float32),   # extended dist
        jax.ShapeDtypeStruct((B, T, S), jnp.float32),       # attentions
        jax.ShapeDtypeStruct((B, T, 1), jnp.float32),       # p_gen
    )
    return pl.pallas_call(
        _attn_out_kernel,
        out_shape=out_shapes,
        grid=(1,),
        in_specs=[
            _full_spec((B, T, H)),
            _full_spec((B, S, H)),
            _full_spec((B, S)),
            _full_spec((H, Vp1)),
            _full_spec((H, Vp1)),
            _full_spec((1, Vp1)),
        ],
        out_specs=[
            _full_spec((B, T, V + S)),
            _full_spec((B, T, S)),
            _full_spec((B, T, 1)),
        ],
        compiler_params=pltpu.CompilerParams(
            dimension_semantics=("arbitrary",)),
    )(dec_bth, enc_bsh, mask, w_h_ext, w_c_ext, b_ext)


# ------------------------------ Seq2Seq model --------------------------------
class Seq2Seq:
    def __init__(self, key, copying=True, copy_forcing=False):
        self.copying = copying
        self.copy_forcing = copy_forcing
        self.pad_idx = PAD_IDX
        # src_to_trg buffer (deterministic synthetic mapping, like the original
        # non-trainable Parameter built from the vocab maps)
        self.src_to_trg = jnp.arange(SRC_VOCAB, dtype=jnp.int32) % TRG_VOCAB

        ks = jax.random.split(key, 12)
        scale = 0.1
        f = lambda k, s: (scale * jax.random.normal(k, s)).astype(jnp.float32)
        # encoder params
        self.enc_emb = f(ks[0], (SRC_VOCAB, EMB))
        self.enc_wih = f(ks[1], (EMB, HID))
        self.enc_whh = f(ks[2], (HID, HID))
        self.enc_b = f(ks[3], (1, HID))
        # decoder params
        self.dec_emb = f(ks[4], (TRG_VOCAB, EMB))
        self.dec_wih = f(ks[5], (EMB, HID))
        self.dec_whh = f(ks[6], (HID, HID))
        self.dec_b = f(ks[7], (1, HID))
        # output projection (split halves of the [h; ctx] -> V weight)
        self.w_out_h = f(ks[8], (HID, TRG_VOCAB))
        self.w_out_c = f(ks[9], (HID, TRG_VOCAB))
        self.b_out = jnp.zeros((1, TRG_VOCAB), jnp.float32)
        # pointer-generator gate
        self.w_pg_h = f(ks[10], (HID, 1))
        self.w_pg_c = f(ks[11], (HID, 1))
        self.b_pg = jnp.zeros((1, 1), jnp.float32)
        # fused [output | p_gen] projection weights (gate rides on the V-wide matmul)
        self.w_out_ext_h = jnp.concatenate([self.w_out_h, self.w_pg_h], axis=1)  # (H, V+1)
        self.w_out_ext_c = jnp.concatenate([self.w_out_c, self.w_pg_c], axis=1)  # (H, V+1)
        self.b_out_ext = jnp.concatenate([self.b_out, self.b_pg], axis=1)        # (1, V+1)

    # --- components (concrete stand-ins for the injected encoder/decoder) ---
    def generate_mask(self, inputs, input_lens):
        return [
            (jnp.arange(i.shape[0])[None, :] < il[:, None]).astype(jnp.float32)
            for i, il in zip(inputs, input_lens)
        ]

    def encoder(self, inputs, input_lens):
        src = inputs[0]                             # (S, B) int32
        S, B = src.shape
        emb = self.enc_emb[src].reshape(S * B, EMB)  # time-major rows
        h0 = jnp.zeros((B, HID), jnp.float32)
        enc_flat = rnn_forward(h0, emb, self.enc_wih, self.enc_whh, self.enc_b)
        enc_out = enc_flat.reshape(S, B, HID)       # (S, B, H)
        agenda = enc_out[-1]                        # (B, H)
        return enc_out, agenda

    def decoder(self, agenda, output, encoder_outputs, att_masks):
        T, B = output.shape
        trg_emb = self.dec_emb[output].reshape(T * B, EMB)
        dec_flat = rnn_forward(agenda, trg_emb,
                               self.dec_wih, self.dec_whh, self.dec_b)
        # batch-major layouts for the fused attention kernel (tiny transposes)
        dec_bth = jnp.transpose(dec_flat.reshape(T, B, HID), (1, 0, 2))  # (B,T,H)
        enc_bsh = jnp.transpose(encoder_outputs, (1, 0, 2))              # (B,S,H)
        probs, attn, pgen = attend_project(
            dec_bth, enc_bsh, att_masks[0],
            self.w_out_ext_h, self.w_out_ext_c, self.b_out_ext)
        outputs = jnp.transpose(probs, (1, 0, 2))       # (T, B, V+S)
        attentions = jnp.transpose(attn, (1, 0, 2))     # (T, B, S)
        p_gen = jnp.transpose(pgen, (1, 0, 2))          # (T, B, 1)
        # TODO(synk): copy mass is appended as raw source-position probabilities;
        # scattering it onto src_to_trg-mapped target ids (dynamic vocab) is not ported.
        predictions = jnp.argmax(outputs, axis=-1).astype(jnp.int32)
        return outputs, predictions, attentions, p_gen

    # --------------------------------- forward -------------------------------
    def __call__(self, inputs, input_lens, output, inference=False,
                 beam_size=0, copy_inputs=(), beam_syntax_check=False):
        assert all(int(i.shape[1]) == int(il.shape[0])
                   for i, il in zip(inputs, input_lens))
        assert beam_size <= 0 or inference
        encoder_outputs, agenda = self.encoder(inputs, input_lens)
        # TODO(synk): beam_search / QuerySyntaxChecker path (beam_size > 0) has
        # no clean Pallas equivalent (dynamic Python control flow); not ported.
        # TODO(synk): inference-time greedy feedback loop not ported; this runs
        # the teacher-forced decoder path (output provided), like training.
        outputs, predictions, attentions, p_gen = self.decoder(
            agenda, output, encoder_outputs,
            self.generate_mask(inputs, input_lens))
        return outputs, predictions, attentions, p_gen


# ----------------------------------- main ------------------------------------
if __name__ == "__main__":
    key = jax.random.PRNGKey(0)
    k_model, k_src, k_len, k_trg = jax.random.split(key, 4)

    model = Seq2Seq(k_model, copying=True)

    src = jax.random.randint(k_src, (S_LEN, BATCH), 0, SRC_VOCAB, dtype=jnp.int32)
    input_lens = jax.random.randint(k_len, (BATCH,), 3, S_LEN + 1, dtype=jnp.int32)
    trg = jax.random.randint(k_trg, (T_LEN, BATCH), 0, TRG_VOCAB, dtype=jnp.int32)

    outputs, predictions, attentions, p_gen = model(
        [src], [input_lens], trg,
        inference=False, beam_size=0, copy_inputs=[src])

    jax.block_until_ready((outputs, predictions, attentions, p_gen))

    assert outputs.shape == (T_LEN, BATCH, TRG_VOCAB + S_LEN)
    assert predictions.shape == (T_LEN, BATCH)
    assert attentions.shape == (T_LEN, BATCH, S_LEN)
    assert p_gen.shape == (T_LEN, BATCH, 1)
    print("KERNEL_OK")
</pallas_src>

<mosaic_0001>
module attributes {stable_mosaic.version = 11 : i64} {
  func.func @_rnn_kernel(%arg0: i32, %arg1: memref<4x32xf32, #tpu.memory_space<vmem>>, %arg2: memref<32x32xf32, #tpu.memory_space<vmem>>, %arg3: memref<32x32xf32, #tpu.memory_space<vmem>>, %arg4: memref<32x32xf32, #tpu.memory_space<vmem>>, %arg5: memref<1x32xf32, #tpu.memory_space<vmem>>, %arg6: memref<32x32xf32, #tpu.memory_space<vmem>>) attributes {dimension_semantics = [#tpu.dimension_semantics<arbitrary>], iteration_bounds = array<i64: 1>, scalar_prefetch = 0 : i64, scratch_operands = 0 : i64, tpu.core_type = #tpu.core_type<tc>, window_params = [{pipeline_mode = #tpu.pipeline_mode<synchronous>, transform_indices = @transform_0, window_bounds = array<i64: 4, 32>}, {pipeline_mode = #tpu.pipeline_mode<synchronous>, transform_indices = @transform_1, window_bounds = array<i64: 32, 32>}, {pipeline_mode = #tpu.pipeline_mode<synchronous>, transform_indices = @transform_2, window_bounds = array<i64: 32, 32>}, {pipeline_mode = #tpu.pipeline_mode<synchronous>, transform_indices = @transform_3, window_bounds = array<i64: 32, 32>}, {pipeline_mode = #tpu.pipeline_mode<synchronous>, transform_indices = @transform_4, window_bounds = array<i64: 1, 32>}, {pipeline_mode = #tpu.pipeline_mode<synchronous>, transform_indices = @transform_5, window_bounds = array<i64: 32, 32>}]} {
    %c0 = arith.constant 0 : index
    %c0_0 = arith.constant 0 : index
    %0 = vector.load %arg2[%c0, %c0_0] : memref<32x32xf32, #tpu.memory_space<vmem>>, vector<32x32xf32>
    %c0_1 = arith.constant 0 : index
    %c0_2 = arith.constant 0 : index
    %1 = vector.load %arg3[%c0_1, %c0_2] : memref<32x32xf32, #tpu.memory_space<vmem>>, vector<32x32xf32>
    %cst = arith.constant dense<0.000000e+00> : vector<32x32xf32>
    %2 = tpu.matmul %0, %1, %cst {dimension_numbers = #tpu.dot_dimension_numbers<[1], [0], [0], [1], [0, 0, 1, 1], [], []>} : vector<32x32xf32>, vector<32x32xf32>, vector<32x32xf32> -> vector<32x32xf32>
    %c0_3 = arith.constant 0 : index
    %c0_4 = arith.constant 0 : index
    %3 = vector.load %arg5[%c0_3, %c0_4] : memref<1x32xf32, #tpu.memory_space<vmem>>, vector<1x32xf32>
    %4 = vector.broadcast %3 : vector<1x32xf32> to vector<32x32xf32>
    %5 = arith.addf %2, %4 : vector<32x32xf32>
    %c0_5 = arith.constant 0 : index
    %c0_6 = arith.constant 0 : index
    %6 = vector.load %arg4[%c0_5, %c0_6] : memref<32x32xf32, #tpu.memory_space<vmem>>, vector<32x32xf32>
    %c0_7 = arith.constant 0 : index
    %c0_8 = arith.constant 0 : index
    %7 = vector.load %arg1[%c0_7, %c0_8] : memref<4x32xf32, #tpu.memory_space<vmem>>, vector<4x32xf32>
    %8 = vector.extract_strided_slice %5 {offsets = [0, 0], sizes = [4, 32], strides = [1, 1]} : vector<32x32xf32> to vector<4x32xf32>
    %cst_9 = arith.constant dense<0.000000e+00> : vector<4x32xf32>
    %9 = tpu.matmul %7, %6, %cst_9 {dimension_numbers = #tpu.dot_dimension_numbers<[1], [0], [0], [1], [0, 0, 1, 1], [], []>} : vector<4x32xf32>, vector<32x32xf32>, vector<4x32xf32> -> vector<4x32xf32>
    %10 = arith.addf %8, %9 : vector<4x32xf32>
    %11 = math.tanh %10 : vector<4x32xf32>
    %c0_10 = arith.constant 0 : index
    %c0_11 = arith.constant 0 : index
    %12 = vector.load %arg6[%c0_10, %c0_11] : memref<32x32xf32, #tpu.memory_space<vmem>>, vector<4x32xf32>
    tpu.vector_store %arg6[%c0_10, %c0_11], %11 {strides = array<i32>} : memref<32x32xf32, #tpu.memory_space<vmem>>, vector<4x32xf32>,
    %13 = vector.extract_strided_slice %5 {offsets = [4, 0], sizes = [4, 32], strides = [1, 1]} : vector<32x32xf32> to vector<4x32xf32>
    %cst_12 = arith.constant dense<0.000000e+00> : vector<4x32xf32>
    %14 = tpu.matmul %11, %6, %cst_12 {dimension_numbers = #tpu.dot_dimension_numbers<[1], [0], [0], [1], [0, 0, 1, 1], [], []>} : vector<4x32xf32>, vector<32x32xf32>, vector<4x32xf32> -> vector<4x32xf32>
    %15 = arith.addf %13, %14 : vector<4x32xf32>
    %16 = math.tanh %15 : vector<4x32xf32>
    %c4 = arith.constant 4 : index
    %c0_13 = arith.constant 0 : index
    %17 = vector.load %arg6[%c4, %c0_13] : memref<32x32xf32, #tpu.memory_space<vmem>>, vector<4x32xf32>
    tpu.vector_store %arg6[%c4, %c0_13], %16 {strides = array<i32>} : memref<32x32xf32, #tpu.memory_space<vmem>>, vector<4x32xf32>,
    %18 = vector.extract_strided_slice %5 {offsets = [8, 0], sizes = [4, 32], strides = [1, 1]} : vector<32x32xf32> to vector<4x32xf32>
    %cst_14 = arith.constant dense<0.000000e+00> : vector<4x32xf32>
    %19 = tpu.matmul %16, %6, %cst_14 {dimension_numbers = #tpu.dot_dimension_numbers<[1], [0], [0], [1], [0, 0, 1, 1], [], []>} : vector<4x32xf32>, vector<32x32xf32>, vector<4x32xf32> -> vector<4x32xf32>
    %20 = arith.addf %18, %19 : vector<4x32xf32>
    %21 = math.tanh %20 : vector<4x32xf32>
    %c8 = arith.constant 8 : index
    %c0_15 = arith.constant 0 : index
    %22 = vector.load %arg6[%c8, %c0_15] : memref<32x32xf32, #tpu.memory_space<vmem>>, vector<4x32xf32>
    tpu.vector_store %arg6[%c8, %c0_15], %21 {strides = array<i32>} : memref<32x32xf32, #tpu.memory_space<vmem>>, vector<4x32xf32>,
    %23 = vector.extract_strided_slice %5 {offsets = [12, 0], sizes = [4, 32], strides = [1, 1]} : vector<32x32xf32> to vector<4x32xf32>
    %cst_16 = arith.constant dense<0.000000e+00> : vector<4x32xf32>
    %24 = tpu.matmul %21, %6, %cst_16 {dimension_numbers = #tpu.dot_dimension_numbers<[1], [0], [0], [1], [0, 0, 1, 1], [], []>} : vector<4x32xf32>, vector<32x32xf32>, vector<4x32xf32> -> vector<4x32xf32>
    %25 = arith.addf %23, %24 : vector<4x32xf32>
    %26 = math.tanh %25 : vector<4x32xf32>
    %c12 = arith.constant 12 : index
    %c0_17 = arith.constant 0 : index
    %27 = vector.load %arg6[%c12, %c0_17] : memref<32x32xf32, #tpu.memory_space<vmem>>, vector<4x32xf32>
    tpu.vector_store %arg6[%c12, %c0_17], %26 {strides = array<i32>} : memref<32x32xf32, #tpu.memory_space<vmem>>, vector<4x32xf32>,
    %28 = vector.extract_strided_slice %5 {offsets = [16, 0], sizes = [4, 32], strides = [1, 1]} : vector<32x32xf32> to vector<4x32xf32>
    %cst_18 = arith.constant dense<0.000000e+00> : vector<4x32xf32>
    %29 = tpu.matmul %26, %6, %cst_18 {dimension_numbers = #tpu.dot_dimension_numbers<[1], [0], [0], [1], [0, 0, 1, 1], [], []>} : vector<4x32xf32>, vector<32x32xf32>, vector<4x32xf32> -> vector<4x32xf32>
    %30 = arith.addf %28, %29 : vector<4x32xf32>
    %31 = math.tanh %30 : vector<4x32xf32>
    %c16 = arith.constant 16 : index
    %c0_19 = arith.constant 0 : index
    %32 = vector.load %arg6[%c16, %c0_19] : memref<32x32xf32, #tpu.memory_space<vmem>>, vector<4x32xf32>
    tpu.vector_store %arg6[%c16, %c0_19], %31 {strides = array<i32>} : memref<32x32xf32, #tpu.memory_space<vmem>>, vector<4x32xf32>,
    %33 = vector.extract_strided_slice %5 {offsets = [20, 0], sizes = [4, 32], strides = [1, 1]} : vector<32x32xf32> to vector<4x32xf32>
    %cst_20 = arith.constant dense<0.000000e+00> : vector<4x32xf32>
    %34 = tpu.matmul %31, %6, %cst_20 {dimension_numbers = #tpu.dot_dimension_numbers<[1], [0], [0], [1], [0, 0, 1, 1], [], []>} : vector<4x32xf32>, vector<32x32xf32>, vector<4x32xf32> -> vector<4x32xf32>
    %35 = arith.addf %33, %34 : vector<4x32xf32>
    %36 = math.tanh %35 : vector<4x32xf32>
    %c20 = arith.constant 20 : index
    %c0_21 = arith.constant 0 : index
    %37 = vector.load %arg6[%c20, %c0_21] : memref<32x32xf32, #tpu.memory_space<vmem>>, vector<4x32xf32>
    tpu.vector_store %arg6[%c20, %c0_21], %36 {strides = array<i32>} : memref<32x32xf32, #tpu.memory_space<vmem>>, vector<4x32xf32>,
    %38 = vector.extract_strided_slice %5 {offsets = [24, 0], sizes = [4, 32], strides = [1, 1]} : vector<32x32xf32> to vector<4x32xf32>
    %cst_22 = arith.constant dense<0.000000e+00> : vector<4x32xf32>
    %39 = tpu.matmul %36, %6, %cst_22 {dimension_numbers = #tpu.dot_dimension_numbers<[1], [0], [0], [1], [0, 0, 1, 1], [], []>} : vector<4x32xf32>, vector<32x32xf32>, vector<4x32xf32> -> vector<4x32xf32>
    %40 = arith.addf %38, %39 : vector<4x32xf32>
    %41 = math.tanh %40 : vector<4x32xf32>
    %c24 = arith.constant 24 : index
    %c0_23 = arith.constant 0 : index
    %42 = vector.load %arg6[%c24, %c0_23] : memref<32x32xf32, #tpu.memory_space<vmem>>, vector<4x32xf32>
    tpu.vector_store %arg6[%c24, %c0_23], %41 {strides = array<i32>} : memref<32x32xf32, #tpu.memory_space<vmem>>, vector<4x32xf32>,
    %43 = vector.extract_strided_slice %5 {offsets = [28, 0], sizes = [4, 32], strides = [1, 1]} : vector<32x32xf32> to vector<4x32xf32>
    %cst_24 = arith.constant dense<0.000000e+00> : vector<4x32xf32>
    %44 = tpu.matmul %41, %6, %cst_24 {dimension_numbers = #tpu.dot_dimension_numbers<[1], [0], [0], [1], [0, 0, 1, 1], [], []>} : vector<4x32xf32>, vector<32x32xf32>, vector<4x32xf32> -> vector<4x32xf32>
    %45 = arith.addf %43, %44 : vector<4x32xf32>
    %46 = math.tanh %45 : vector<4x32xf32>
    %c28 = arith.constant 28 : index
    %c0_25 = arith.constant 0 : index
    %47 = vector.load %arg6[%c28, %c0_25] : memref<32x32xf32, #tpu.memory_space<vmem>>, vector<4x32xf32>
    tpu.vector_store %arg6[%c28, %c0_25], %46 {strides = array<i32>} : memref<32x32xf32, #tpu.memory_space<vmem>>, vector<4x32xf32>,
    return
  }
  func.func @transform_0(%arg0: i32) -> (i32, i32) {
    %c0_i32 = arith.constant 0 : i32
    %c0_i32_0 = arith.constant 0 : i32
    %c0_i32_1 = arith.constant 0 : i32
    return %c0_i32, %c0_i32_0 : i32, i32
  }
  func.func @transform_1(%arg0: i32) -> (i32, i32) {
    %c0_i32 = arith.constant 0 : i32
    %c0_i32_0 = arith.constant 0 : i32
    %c0_i32_1 = arith.constant 0 : i32
    return %c0_i32, %c0_i32_0 : i32, i32
  }
  func.func @transform_2(%arg0: i32) -> (i32, i32) {
    %c0_i32 = arith.constant 0 : i32
    %c0_i32_0 = arith.constant 0 : i32
    %c0_i32_1 = arith.constant 0 : i32
    return %c0_i32, %c0_i32_0 : i32, i32
  }
  func.func @transform_3(%arg0: i32) -> (i32, i32) {
    %c0_i32 = arith.constant 0 : i32
    %c0_i32_0 = arith.constant 0 : i32
    %c0_i32_1 = arith.constant 0 : i32
    return %c0_i32, %c0_i32_0 : i32, i32
  }
  func.func @transform_4(%arg0: i32) -> (i32, i32) {
    %c0_i32 = arith.constant 0 : i32
    %c0_i32_0 = arith.constant 0 : i32
    %c0_i32_1 = arith.constant 0 : i32
    return %c0_i32, %c0_i32_0 : i32, i32
  }
  func.func @transform_5(%arg0: i32) -> (i32, i32) {
    %c0_i32 = arith.constant 0 : i32
    %c0_i32_0 = arith.constant 0 : i32
    %c0_i32_1 = arith.constant 0 : i32
    return %c0_i32, %c0_i32_0 : i32, i32
  }
}

</mosaic_0001>

<bundles_post_ra>
// kernel: tpu_custom_call.1
= control target key start
LH: loop header
LB: loop body
LE: loop exit
PB: predicated region body
PF: predicated region fallthrough
CT: control target
= control target key end

     0   :  { %10 = vsyncpa [#allocation3], 0  ;;  %s1318_s0 = inlined_call_operand.hbm [shape: f32[4,32], index: 0, kind: input, shape index: {}]   ;;  %s1319_s1 = inlined_call_operand.hbm [shape: f32[32,32], index: 1, kind: input, shape index: {}]   ;;  %s1320_s2 = inlined_call_operand.hbm [shape: f32[32,32], index: 2, kind: input, shape index: {}]   ;;  %s1321_s3 = inlined_call_operand.hbm [shape: f32[32,32], index: 3, kind: input, shape index: {}]   ;;  %s1322_s4 = inlined_call_operand.vmem [shape: f32[1,32], index: 4, kind: input, shape index: {}]   ;;  %s1323_s5 = inlined_call_operand.hbm [shape: f32[32,32], index: 5, kind: output, shape index: {}]  }
   0x1   :  { %11 = vsyncpa [#allocation6], 0 }
   0x2   :  { %12 = vsyncpa [#allocation9], 0 }
   0x3   :  { %13 = vsyncpa [#allocation4], 0  ;;  %s1132_s18 = smov [#allocation5]  }
   0x4   :  { %s29_s19 = sshll.u32 %s1132_s18, 4  ;;  %s30_s19 = int_to_ptr.vmem [resolvable:$true] %s29_s19 }
   0x5   :  { %s1032_s20 = scalar_lea.vmem %s30_s19, 512  ;;  %p1037_p1 = scmp.lt.s32.totalorder %s30_s19, %s30_s19 }
   0x6   :  { %p1033_p0 = scmp.ne.s32.totalorder %s30_s19, %s1032_s20  ;;  %p1038_p2 = scmp.lt.s32.totalorder %s1032_s20, %s1032_s20 }
   0x8   :  { %p1039_p3 = por %p1038_p2, %p1037_p1 }
   0xa   :  { %p1040_p4 = pnand %p1039_p3, %p1033_p0 }
   0xc   :  { %1043 = shalt.err (!%p1040_p4)
}
   0xd   :  { %s1133_s21 = smov 128   ;;  %s1134_s22 = smov 8  }
   0xe   :  { %35 = dma.hbm_to_vmem [thread:$0]  %s1319_s1, 512, %s30_s19, [#allocation6], %s1133_s21, %s1133_s21, %s1134_s22  }
   0xf   :  { %s1135_s25 = smov [#allocation2]   ;;  %s1136_s27 = smov [#allocation7]  }
  0x10   :  { %s20_s26 = sshll.u32 %s1135_s25, 4  ;;  %s41_s28 = sshll.u32 %s1136_s27, 4  ;;  %s21_s26 = int_to_ptr.vmem [resolvable:$true] %s20_s26  ;;  %s42_s28 = int_to_ptr.vmem [resolvable:$true] %s41_s28 }
  0x11   :  { %s1052_s29 = scalar_lea.vmem %s21_s26, 64  ;;  %p1057_p6 = scmp.lt.s32.totalorder %s21_s26, %s21_s26 }
  0x12   :  { %p1053_p5 = scmp.ne.s32.totalorder %s21_s26, %s1052_s29  ;;  %p1058_p7 = scmp.lt.s32.totalorder %s1052_s29, %s1052_s29 }
  0x14   :  { %p1059_p8 = por %p1058_p7, %p1057_p6 }
  0x16   :  { %p1060_p9 = pnand %p1059_p8, %p1053_p5 }
  0x18   :  { %1063 = shalt.err (!%p1060_p9)
}
  0x19   :  { %23 = dma.hbm_to_vmem [thread:$0]  %s1318_s0, 64, %s21_s26, [#allocation3]  }
  0x1a   :  { %s1072_s7 = scalar_lea.vmem %s42_s28, 512  ;;  %p1077_p11 = scmp.lt.s32.totalorder %s42_s28, %s42_s28 }
  0x1b   :  { %p1073_p10 = scmp.ne.s32.totalorder %s42_s28, %s1072_s7  ;;  %p1078_p12 = scmp.lt.s32.totalorder %s1072_s7, %s1072_s7 }
  0x1d   :  { %p1079_p13 = por %p1078_p12, %p1077_p11 }
  0x1f   :  { %p1080_p0 = pnand %p1079_p13, %p1073_p10 }
  0x21   :  { %1083 = shalt.err (!%p1080_p0)
}
  0x22   :  { %47 = dma.hbm_to_vmem [thread:$0]  %s1320_s2, 512, %s42_s28, [#allocation6], %s1133_s21, %s1133_s21, %s1134_s22  }
  0x23   :  { %s1137_s9 = smov [#allocation8]  }
  0x24   :  { %s53_s10 = sshll.u32 %s1137_s9, 4  ;;  %s54_s10 = int_to_ptr.vmem [resolvable:$true] %s53_s10 }
  0x25   :  { %s1092_s11 = scalar_lea.vmem %s54_s10, 512  ;;  %p1097_p2 = scmp.lt.s32.totalorder %s54_s10, %s54_s10 }
  0x26   :  { %p1093_p1 = scmp.ne.s32.totalorder %s54_s10, %s1092_s11  ;;  %p1098_p3 = scmp.lt.s32.totalorder %s1092_s11, %s1092_s11 }
  0x28   :  { %p1099_p4 = por %p1098_p3, %p1097_p2 }
  0x2a   :  { %p1100_p5 = pnand %p1099_p4, %p1093_p1 }
  0x2c   :  { %1103 = shalt.err (!%p1100_p5)
}
  0x2d   :  { %59 = dma.hbm_to_vmem [thread:$0]  %s1321_s3, 512, %s54_s10, [#allocation9], %s1133_s21, %s1133_s21, %s1134_s22  }
  0x2e   :  { %1124 = dma.done.wait [#allocation3], 64  }
  0x2f   :  { %1125 = vsyncadd [#allocation3], 4294967232 }
  0x30   :  { %1126 = dma.done.wait [#allocation6], 1024  }
  0x31   :  { %1127 = vsyncadd [#allocation6], 4294966272 }
  0x32   :  { %1128 = dma.done.wait [#allocation9], 512  }
  0x33   :  { %1129 = vsyncadd [#allocation9], 4294966784  ;;  %v1138_v0 = vmov 0.0   ;;  %vm1139_vm0 = vmmov 0   ;;  %v81_v1 = vld [vmem:[#allocation7 + $0x18] sm:$0xff]  ;;  %v80_v2 = vld [vmem:[#allocation7 + $0x10] sm:$0xff] }
  0x34   :  { %911 = vmatprep.subr.mxu1 %v1138_v0  ;;  %919 = vmatprep.mubr.msk.f32.mxu1 %vm1139_vm0, %v1138_v0  ;;  %v1195_v3 = vld [vmem:[#allocation8 + $0x18] sm:$0xff]  ;;  %v1198_v4 = vld [vmem:[#allocation8 + $0x10] sm:$0xff]  ;;  %v79_v5 = vld [vmem:[#allocation7 + $0x8] sm:$0xff]  ;;  %vm89_vm1 = vcmask 261120   ;;  %vm267_vm2 = vcmask 257024   ;;  %vm347_vm3 = vcmask 261124  }
  0x35   :  { %897 = vmatprep.subr.mxu0 %v81_v1  ;;  %912 = vmatpush3.msra.mxu1 %v1195_v3  ;;  %v74_v6 = vld [vmem:[#allocation5] sm:$0xff]  ;;  %v1202_v7 = vld [vmem:[#allocation8 + $0x8] sm:$0xff]  ;;  %v191_v11 = vld [vmem:[#allocation2] sm:$0xf] }
  0x36   :  { %898 = vmatpush3.msra.mxu0 %v81_v1  ;;  %913 = vmatprep.subr.mxu1 %v1138_v0  ;;  %v78_v8 = vld [vmem:[#allocation7] sm:$0xff]  ;;  %v75_v10 = vld [vmem:[#allocation5 + $0x8] sm:$0xff]  ;;  %v76_v12 = vld [vmem:[#allocation5 + $0x10] sm:$0xff] }
  0x37   :  { %899 = vmatprep.subr.mxu0 %v80_v2  ;;  %914 = vmatpush3.msra.mxu1 %v1198_v4  ;;  %v1206_v9 = vld [vmem:[#allocation8] sm:$0xff]  ;;  %v77_v13 = vld [vmem:[#allocation5 + $0x18] sm:$0xff] }
  0x38   :  { %900 = vmatpush3.msra.mxu0 %v80_v2  ;;  %915 = vmatprep.subr.mxu1 %v1138_v0  ;;  %v1240_v16 = vld [vmem:[%s1322_s4] ss:$0 sm:$0xff]  ;;  %s1140_s4 = smov [#allocation10]  }
  0x39   :  { %901 = vmatprep.subr.mxu0 %v79_v5  ;;  %905 = vmatprep.mubr.msk.f32.mxu0 %vm89_vm1, %v74_v6  ;;  %s822_s13 = sshll.u32 %s1140_s4, 4  ;;  %s823_s13 = int_to_ptr.vmem [resolvable:$true] %s822_s13 }
  0x3a   :  { %902 = vmatpush3.msra.mxu0 %v79_v5  ;;  %916 = vmatpush3.msra.mxu1 %v1202_v7  ;;  %s1104_s14 = scalar_lea.vmem %s823_s13, 512  ;;  %p1109_p7 = scmp.lt.s32.totalorder %s823_s13, %s823_s13 }
  0x3b   :  { %903 = vmatprep.subr.mxu0 %v78_v8  ;;  %917 = vmatprep.subr.mxu1 %v1138_v0  ;;  %p1105_p6 = scmp.ne.s32.totalorder %s823_s13, %s1104_s14  ;;  %p1110_p8 = scmp.lt.s32.totalorder %s1104_s14, %s1104_s14 }
  0x3c   :  { %904 = vmatpush3.msra.mxu0 %v78_v8  ;;  %918 = vmatpush3.msra.mxu1 %v1206_v9 }
  0x3d   :  { %906 = vmatmul.mubr.msk.f32.vlgmr.msra.gmra.mxu0 %vm89_vm1, %v75_v10  ;;  %920 = vmatmul.mubr.msk.f32.vlgmr.msra.gmra.mxu1 %vm89_vm1, %v191_v11  ;;  %p1111_p9 = por %p1110_p8, %p1109_p7 }
  0x3e   :  { %922 = vmatprep.subr.mxu0 %v1138_v0  ;;  %933 = vmatprep.subr.mxu1 %v1138_v0 }
  0x3f   :  { %923 = vmatpush3.msra.mxu0 %v1195_v3  ;;  %934 = vmatpush3.msra.mxu1 %v1195_v3  ;;  %p1112_p10 = pnand %p1111_p9, %p1105_p6 }
  0x40   :  { %924 = vmatprep.subr.mxu0 %v1138_v0  ;;  %935 = vmatprep.subr.mxu1 %v1138_v0 }
  0x41   :  { %925 = vmatpush3.msra.mxu0 %v1198_v4  ;;  %936 = vmatpush3.msra.mxu1 %v1198_v4 }
  0x42   :  { %926 = vmatprep.subr.mxu0 %v1138_v0  ;;  %937 = vmatprep.subr.mxu1 %v1138_v0 }
  0x43   :  { %927 = vmatpush3.msra.mxu0 %v1202_v7  ;;  %938 = vmatpush3.msra.mxu1 %v1202_v7 }
  0x44   :  { %928 = vmatprep.subr.mxu0 %v1138_v0  ;;  %939 = vmatprep.subr.mxu1 %v1138_v0 }
  0x45   :  { %929 = vmatpush3.msra.mxu0 %v1206_v9  ;;  %940 = vmatpush3.msra.mxu1 %v1206_v9 }
  0x46   :  { %941 = vmatprep.mubr.msk.f32.mxu1 %vm1139_vm0, %v1138_v0  ;;  %944 = vmatprep.subr.mxu0 %v1138_v0 }
  0x47   :  { %955 = vmatprep.subr.mxu1 %v1138_v0  ;;  %908 = vmatprep.mubr.msk.f32.mxu0 %vm89_vm1, %v76_v12 }
  0x48   :  { %909 = vmatmul.mubr.msk.f32.gmra.mxu0 %vm89_vm1, %v77_v13 }
  0x49   :  { %930 = vmatprep.mubr.msk.f32.mxu0 %vm1139_vm0, %v1138_v0 }
  0xfd   :  { %v907_v14 = vpop.f32.mrf.mxu0  ;;  %v261_v15 = vpop.f32.mrf.mxu1 }
  0xfe   :  { %v174_v30 = vadd.f32 %v907_v14, %v1240_v16 }
  0xff   :  { %v168_v17 = vpop.f32.mrf.mxu0  ;;  %v921_v18 = vpop.f32.mrf.mxu1 }
 0x100   :  { %v169_v19 = vadd.f32 %v1240_v16, %v168_v17 }
 0x102   :  { %v265_v20 = vadd.f32 %v261_v15, %v169_v19 }
 0x104   :  { %1008 = vtanh.f32 %v265_v20 }
 0x108   :  { %v1255_v22 = vpop.f32.mrf.mxu0 }
 0x109   :  { %v184_v52 = vadd.f32 %v1255_v22, %v1240_v16 }
 0x10a   :  { %v178_v23 = vpop.f32.mrf.mxu0 }
 0x10b   :  { %v179_v41 = vadd.f32 %v1240_v16, %v178_v23 }
 0x111   :  { %v1009_v21 = vpop.eup %1008 }
 0x112   :  { %931 = vmatmul.mubr.msk.f32.vlgmr.msra.gmra.mxu0 %vm89_vm1, %v1009_v21  ;;  %268 = vst.msk [vmem:[#allocation10] sm:$0xf] %vm267_vm2, %v1009_v21 }
 0x113   :  { %945 = vmatpush3.msra.mxu0 %v1195_v3  ;;  %952 = vmatprep.mubr.msk.f32.mxu0 %vm1139_vm0, %v1138_v0 }
 0x114   :  { %946 = vmatprep.subr.mxu0 %v1138_v0 }
 0x115   :  { %947 = vmatpush3.msra.mxu0 %v1198_v4 }
 0x116   :  { %948 = vmatprep.subr.mxu0 %v1138_v0 }
 0x117   :  { %949 = vmatpush3.msra.mxu0 %v1202_v7 }
 0x118   :  { %950 = vmatprep.subr.mxu0 %v1138_v0 }
 0x119   :  { %951 = vmatpush3.msra.mxu0 %v1206_v9 }
 0x11a   :  { %966 = vmatprep.subr.mxu0 %v1138_v0 }
 0x1d2   :  { %v338_v24 = vpop.f32.mrf.mxu0 }
 0x1d3   :  { %v343_v25 = vrot.slane %v338_v24, 4 }
 0x1d4   :  { %v932_v26 = vpop.f32.mrf.mxu0 }
 0x1d5   :  { %v345_v27 = vadd.f32 %v343_v25, %v169_v19 }
 0x1d7   :  { %1010 = vtanh.f32 %v345_v27 }
 0x1e4   :  { %v1011_v28 = vpop.eup %1010 }
 0x1e5   :  { %v350_v29 = vrot.slane %v1011_v28, 4  ;;  %348 = vst.msk [vmem:[#allocation10] sm:$0xf0] %vm347_vm3, %v1011_v28 }
 0x1e7   :  { %942 = vmatmul.mubr.msk.f32.vlgmr.msra.gmra.mxu1 %vm89_vm1, %v350_v29 }
 0x1e8   :  { %956 = vmatpush3.msra.mxu1 %v1195_v3  ;;  %963 = vmatprep.mubr.msk.f32.mxu1 %vm1139_vm0, %v1138_v0 }
 0x1e9   :  { %957 = vmatprep.subr.mxu1 %v1138_v0 }
 0x1ea   :  { %958 = vmatpush3.msra.mxu1 %v1198_v4 }
 0x1eb   :  { %959 = vmatprep.subr.mxu1 %v1138_v0 }
 0x1ec   :  { %960 = vmatpush3.msra.mxu1 %v1202_v7 }
 0x1ed   :  { %961 = vmatprep.subr.mxu1 %v1138_v0 }
 0x1ee   :  { %962 = vmatpush3.msra.mxu1 %v1206_v9 }
 0x1ef   :  { %977 = vmatprep.subr.mxu1 %v1138_v0 }
 0x2a7   :  { %v419_v31 = vpop.f32.mrf.mxu1 }
 0x2a8   :  { %v423_v32 = vadd.f32 %v419_v31, %v174_v30 }
 0x2a9   :  { %v943_v33 = vpop.f32.mrf.mxu1 }
 0x2aa   :  { %1012 = vtanh.f32 %v423_v32 }
 0x2b7   :  { %v1013_v34 = vpop.eup %1012 }
 0x2b8   :  { %953 = vmatmul.mubr.msk.f32.vlgmr.msra.gmra.mxu0 %vm89_vm1, %v1013_v34  ;;  %425 = vst.msk [vmem:[#allocation10 + $0x8] sm:$0xf] %vm267_vm2, %v1013_v34 }
 0x2b9   :  { %967 = vmatpush3.msra.mxu0 %v1195_v3  ;;  %974 = vmatprep.mubr.msk.f32.mxu0 %vm1139_vm0, %v1138_v0 }
 0x2ba   :  { %968 = vmatprep.subr.mxu0 %v1138_v0 }
 0x2bb   :  { %969 = vmatpush3.msra.mxu0 %v1198_v4 }
 0x2bc   :  { %970 = vmatprep.subr.mxu0 %v1138_v0 }
 0x2bd   :  { %971 = vmatpush3.msra.mxu0 %v1202_v7 }
 0x2be   :  { %972 = vmatprep.subr.mxu0 %v1138_v0 }
 0x2bf   :  { %973 = vmatpush3.msra.mxu0 %v1206_v9 }
 0x2c0   :  { %988 = vmatprep.subr.mxu0 %v1138_v0 }
 0x378   :  { %v495_v35 = vpop.f32.mrf.mxu0 }
 0x379   :  { %v500_v36 = vrot.slane %v495_v35, 4 }
 0x37a   :  { %v954_v37 = vpop.f32.mrf.mxu0 }
 0x37b   :  { %v502_v38 = vadd.f32 %v500_v36, %v174_v30 }
 0x37d   :  { %1014 = vtanh.f32 %v502_v38 }
 0x38a   :  { %v1015_v39 = vpop.eup %1014 }
 0x38b   :  { %v506_v40 = vrot.slane %v1015_v39, 4  ;;  %504 = vst.msk [vmem:[#allocation10 + $0x8] sm:$0xf0] %vm347_vm3, %v1015_v39 }
 0x38d   :  { %964 = vmatmul.mubr.msk.f32.vlgmr.msra.gmra.mxu1 %vm89_vm1, %v506_v40 }
 0x38e   :  { %978 = vmatpush3.msra.mxu1 %v1195_v3  ;;  %985 = vmatprep.mubr.msk.f32.mxu1 %vm1139_vm0, %v1138_v0 }
 0x38f   :  { %979 = vmatprep.subr.mxu1 %v1138_v0 }
 0x390   :  { %980 = vmatpush3.msra.mxu1 %v1198_v4 }
 0x391   :  { %981 = vmatprep.subr.mxu1 %v1138_v0 }
 0x392   :  { %982 = vmatpush3.msra.mxu1 %v1202_v7 }
 0x393   :  { %983 = vmatprep.subr.mxu1 %v1138_v0 }
 0x394   :  { %984 = vmatpush3.msra.mxu1 %v1206_v9 }
 0x44d   :  { %v575_v42 = vpop.f32.mrf.mxu1 }
 0x44e   :  { %v579_v43 = vadd.f32 %v575_v42, %v179_v41 }
 0x44f   :  { %v965_v44 = vpop.f32.mrf.mxu1 }
 0x450   :  { %1016 = vtanh.f32 %v579_v43 }
 0x45d   :  { %v1017_v45 = vpop.eup %1016 }
 0x45e   :  { %975 = vmatmul.mubr.msk.f32.vlgmr.msra.gmra.mxu0 %vm89_vm1, %v1017_v45  ;;  %581 = vst.msk [vmem:[#allocation10 + $0x10] sm:$0xf] %vm267_vm2, %v1017_v45 }
 0x45f   :  { %989 = vmatpush3.msra.mxu0 %v1195_v3  ;;  %996 = vmatprep.mubr.msk.f32.mxu0 %vm1139_vm0, %v1138_v0 }
 0x460   :  { %990 = vmatprep.subr.mxu0 %v1138_v0 }
 0x461   :  { %991 = vmatpush3.msra.mxu0 %v1198_v4 }
 0x462   :  { %992 = vmatprep.subr.mxu0 %v1138_v0 }
 0x463   :  { %993 = vmatpush3.msra.mxu0 %v1202_v7 }
 0x464   :  { %994 = vmatprep.subr.mxu0 %v1138_v0 }
 0x465   :  { %995 = vmatpush3.msra.mxu0 %v1206_v9 }
 0x51e   :  { %v651_v46 = vpop.f32.mrf.mxu0 }
 0x51f   :  { %v656_v47 = vrot.slane %v651_v46, 4 }
 0x520   :  { %v976_v48 = vpop.f32.mrf.mxu0 }
 0x521   :  { %v658_v49 = vadd.f32 %v656_v47, %v179_v41 }
 0x523   :  { %1018 = vtanh.f32 %v658_v49 }
 0x530   :  { %v1019_v50 = vpop.eup %1018 }
 0x531   :  { %v662_v51 = vrot.slane %v1019_v50, 4  ;;  %660 = vst.msk [vmem:[#allocation10 + $0x10] sm:$0xf0] %vm347_vm3, %v1019_v50 }
 0x533   :  { %986 = vmatmul.mubr.msk.f32.vlgmr.msra.gmra.mxu1 %vm89_vm1, %v662_v51 }
 0x5f3   :  { %v731_v53 = vpop.f32.mrf.mxu1 }
 0x5f4   :  { %v735_v54 = vadd.f32 %v731_v53, %v184_v52 }
 0x5f5   :  { %v987_v55 = vpop.f32.mrf.mxu1 }
 0x5f6   :  { %1020 = vtanh.f32 %v735_v54 }
 0x603   :  { %v1021_v56 = vpop.eup %1020 }
 0x604   :  { %997 = vmatmul.mubr.msk.f32.vlgmr.msra.gmra.mxu0 %vm89_vm1, %v1021_v56  ;;  %737 = vst.msk [vmem:[#allocation10 + $0x18] sm:$0xf] %vm267_vm2, %v1021_v56 }
 0x6c4   :  { %v807_v57 = vpop.f32.mrf.mxu0 }
 0x6c5   :  { %v812_v58 = vrot.slane %v807_v57, 4 }
 0x6c6   :  { %v998_v59 = vpop.f32.mrf.mxu0 }
 0x6c7   :  { %v814_v60 = vadd.f32 %v812_v58, %v184_v52 }
 0x6c9   :  { %1022 = vtanh.f32 %v814_v60 }
 0x6d6   :  { %v1023_v61 = vpop.eup %1022 }
 0x6d7   :  { %816 = vst.msk [vmem:[#allocation10 + $0x18] sm:$0xf0] %vm347_vm3, %v1023_v61 }
 0x6d8   :  { %1115 = shalt.err (!%p1112_p10)
}
 0x6d9   :  { %828 = dma.vmem_to_hbm [thread:$0]  %s823_s13, 512, %s1323_s5, [#allocation4], %s1133_s21, %s1133_s21, %s1134_s22  }
 0x6da   :  { %1130 = dma.done.wait [#allocation4], 512  }
 0x6db   :  { %1131 = vsyncadd [#allocation4], 4294966784 }
 0x6dc   :  { %832 = vsyncpa [#allocation3], 1 }
 0x6dd   :  { %833 = vsyncpa [#allocation6], 1 }
 0x6de   :  { %834 = vsyncpa [#allocation9], 1 }
 0x6df   :  { %835 = vsyncpa [#allocation4], 1 }

</bundles_post_ra>
